<compile_context>
chip_gen: v7x
topology: tpu7x:2x2x1
jax: 0.10.0
libtpu: 0.0.40
codegen_flags: <defaults>
</compile_context>

<pallas_src>
import jax
import jax.numpy as jnp
from jax.experimental import pallas as pl
from jax.experimental.pallas import tpu as pltpu

OBSERVATION_SIZE = 4
HIDDEN = 64
OUTPUT_SIZE = 9
DEFAULT_TILE_B = 512   # sweepable (256/512/1024); ~2 MiB total VMEM at 512, well under limits


def _round_up(n, m):
    return ((n + m - 1) // m) * m


def _cdiv(a, b):
    return -(-a // b)


def _choose_tile(batch, tile_b):
    """Balanced batch tile: at most `tile_b` rows, padding capped to <8 rows per tile."""
    n_tiles = max(1, _cdiv(max(batch, 1), tile_b))
    return _round_up(_cdiv(max(batch, 1), n_tiles), 8)


def _kernel(x_ref, w1_ref, b123_ref, w23_ref, w4_ref, b4_ref, o_ref):
    x = x_ref[...]                        # (tb, 4)  f32
    w1 = w1_ref[...]                      # (4, 64)  f32
    b1 = b123_ref[0:1, :]                 # (1, 64)  f32
    b2 = b123_ref[1:2, :]                 # (1, 64)  f32
    b3 = b123_ref[2:3, :]                 # (1, 64)  f32

    mxu_dtype = w23_ref.dtype             # f32 (exact) or bf16 (pre-cast in pack_params)

    # fc1 + ReLU on the VPU: with K=4, four rank-1 broadcast-FMAs beat an MXU dot.
    h = x[:, 0:1] * w1[0:1, :]
    for k in range(1, OBSERVATION_SIZE):
        h = h + x[:, k:k + 1] * w1[k:k + 1, :]
    h = jnp.maximum(h + b1, 0.0)

    # fc2 + ReLU (MXU, f32 accumulation)
    h = jnp.dot(h.astype(mxu_dtype), w23_ref[0], preferred_element_type=jnp.float32)
    h = jnp.maximum(h + b2, 0.0)
    # fc3 + ReLU
    h = jnp.dot(h.astype(mxu_dtype), w23_ref[1], preferred_element_type=jnp.float32)
    h = jnp.maximum(h + b3, 0.0)
    # fc4 -> (tb, 9): written at true width (no lane padding, no wrapper slice pass)
    out = jnp.dot(h.astype(mxu_dtype), w4_ref[...], preferred_element_type=jnp.float32)
    o_ref[...] = (out + b4_ref[...]).astype(o_ref.dtype)


def init_params(key):
    """Deterministic init mirroring nn.Linear's U(-1/sqrt(fan_in), 1/sqrt(fan_in)).
    Weights stored (in_features, out_features) so the kernel computes x @ W + b,
    matching torch.nn.Linear's y = x @ W.T + b."""
    keys = jax.random.split(key, 8)

    def linear(kw, kb, fan_in, fan_out):
        bound = 1.0 / jnp.sqrt(jnp.float32(fan_in))
        w = jax.random.uniform(kw, (fan_in, fan_out), jnp.float32, -bound, bound)
        b = jax.random.uniform(kb, (1, fan_out), jnp.float32, -bound, bound)
        return w, b

    w1, b1 = linear(keys[0], keys[1], OBSERVATION_SIZE, HIDDEN)
    w2, b2 = linear(keys[2], keys[3], HIDDEN, HIDDEN)
    w3, b3 = linear(keys[4], keys[5], HIDDEN, HIDDEN)
    w4, b4 = linear(keys[6], keys[7], HIDDEN, OUTPUT_SIZE)
    return dict(w1=w1, b1=b1, w2=w2, b2=b2, w3=w3, b3=b3, w4=w4, b4=b4)


def pack_params(p, mxu_dtype=jnp.float32):
    """Pack the 8 per-layer tensors into 5 resident operands.

    mxu_dtype: dtype for the MXU weights (w2|w3 and w4). Use jnp.bfloat16 on v6e/v7x
    (native bf16 MXU; removes per-step weight casts and halves weight DMA). fc1 weights
    and all biases stay f32 (fc1/bias/ReLU math runs on the VPU in f32)."""
    b123 = jnp.concatenate(
        [p["b1"].reshape(1, HIDDEN),
         p["b2"].reshape(1, HIDDEN),
         p["b3"].reshape(1, HIDDEN)], axis=0)                       # (3, 64)   f32
    w23 = jnp.stack([p["w2"], p["w3"]], axis=0).astype(mxu_dtype)   # (2, 64, 64)
    w4 = p["w4"].astype(mxu_dtype)                                  # (64, 9)
    b4 = p["b4"].reshape(1, OUTPUT_SIZE)                            # (1, 9)    f32
    return dict(w1=p["w1"], b123=b123, w23=w23, w4=w4, b4=b4)


def net2_forward(x, packed, *, tile_b=DEFAULT_TILE_B):
    """x: (B, OBSERVATION_SIZE) f32; packed: output of pack_params. Returns (B, 9) f32."""
    B = x.shape[0]
    tb = _choose_tile(B, tile_b)
    b_pad = _round_up(max(B, 1), tb)
    if b_pad != B:
        x = jnp.pad(x, ((0, b_pad - B), (0, 0)))

    grid = (b_pad // tb,)
    out = pl.pallas_call(
        _kernel,
        out_shape=jax.ShapeDtypeStruct((b_pad, OUTPUT_SIZE), jnp.float32),
        grid=grid,
        in_specs=[
            pl.BlockSpec((tb, OBSERVATION_SIZE), lambda i: (i, 0)),      # x: tiled over batch
            pl.BlockSpec((OBSERVATION_SIZE, HIDDEN), lambda i: (0, 0)),  # w1: resident
            pl.BlockSpec((3, HIDDEN), lambda i: (0, 0)),                 # b1|b2|b3: resident
            pl.BlockSpec((2, HIDDEN, HIDDEN), lambda i: (0, 0, 0)),      # w2|w3: resident
            pl.BlockSpec((HIDDEN, OUTPUT_SIZE), lambda i: (0, 0)),       # w4: resident
            pl.BlockSpec((1, OUTPUT_SIZE), lambda i: (0, 0)),            # b4: resident
        ],
        out_specs=pl.BlockSpec((tb, OUTPUT_SIZE), lambda i: (i, 0)),     # last dim == full dim
        compiler_params=pltpu.CompilerParams(
            dimension_semantics=("parallel",)),  # batch axis sharded across TCs on v7x
    )(x, packed["w1"], packed["b123"], packed["w23"], packed["w4"], packed["b4"])
    if b_pad != B:
        out = out[:B]   # drop relu(b)-garbage rows from batch padding only
    return out


def net2_forward_ref(x, p):
    """Pure-JAX reference for correctness checking."""
    h = jnp.maximum(x @ p["w1"] + p["b1"], 0.0)
    h = jnp.maximum(h @ p["w2"] + p["b2"], 0.0)
    h = jnp.maximum(h @ p["w3"] + p["b3"], 0.0)
    return h @ p["w4"] + p["b4"]


# TODO(synk): the module's Adam optimizer / MSELoss training step is host-side
# training logic, not part of the forward pass, and is not implemented here.

if __name__ == "__main__":
    key = jax.random.PRNGKey(0)
    k_params, k_x1, k_x2 = jax.random.split(key, 3)

    params = init_params(k_params)
    packed_f32 = pack_params(params)                              # exact PyTorch numerics
    packed_bf16 = pack_params(params, mxu_dtype=jnp.bfloat16)     # v6e/v7x fast path

    # 1) Small batch (single 8-row tile, grid of 1), f32 path, tight tolerance.
    x_small = jax.random.normal(k_x1, (8, OBSERVATION_SIZE), jnp.float32)
    out_small = jax.block_until_ready(net2_forward(x_small, packed_f32))
    ref_small = net2_forward_ref(x_small, params)
    assert out_small.shape == (8, OUTPUT_SIZE)
    assert jnp.allclose(out_small, ref_small, atol=1e-4, rtol=1e-4), "small-batch mismatch"

    # 2) Non-multiple batch with a small tile override -> multi-step parallel grid
    #    (exercises batch padding + resident weights across grid steps), f32, tight tolerance.
    x_big = jax.random.normal(k_x2, (200, OBSERVATION_SIZE), jnp.float32)
    out_big = jax.block_until_ready(net2_forward(x_big, packed_f32, tile_b=64))
    ref_big = net2_forward_ref(x_big, params)
    assert out_big.shape == (200, OUTPUT_SIZE)
    assert jnp.allclose(out_big, ref_big, atol=1e-4, rtol=1e-4), "large-batch mismatch"

    # 3) Same batch, default tile, bf16 MXU weights (f32 accumulation) -> loose tolerance.
    out_bf16 = jax.block_until_ready(net2_forward(x_big, packed_bf16))
    assert out_bf16.shape == (200, OUTPUT_SIZE)
    assert jnp.allclose(out_bf16, ref_big, atol=5e-2, rtol=5e-2), "bf16 path mismatch"

    print("KERNEL_OK")
</pallas_src>

<mosaic_0001>
module attributes {stable_mosaic.version = 11 : i64} {
  func.func @_kernel(%arg0: i32, %arg1: memref<8x4xf32, #tpu.memory_space<vmem>>, %arg2: memref<4x64xf32, #tpu.memory_space<vmem>>, %arg3: memref<3x64xf32, #tpu.memory_space<vmem>>, %arg4: memref<2x64x64xf32, #tpu.memory_space<vmem>>, %arg5: memref<64x9xf32, #tpu.memory_space<vmem>>, %arg6: memref<1x9xf32, #tpu.memory_space<vmem>>, %arg7: memref<8x9xf32, #tpu.memory_space<vmem>>) attributes {dimension_semantics = [#tpu.dimension_semantics<parallel>], iteration_bounds = array<i64: 1>, scalar_prefetch = 0 : i64, scratch_operands = 0 : i64, tpu.core_type = #tpu.core_type<tc>, window_params = [{transform_indices = @transform_0, window_bounds = array<i64: 8, 4>}, {pipeline_mode = #tpu.pipeline_mode<synchronous>, transform_indices = @transform_1, window_bounds = array<i64: 4, 64>}, {pipeline_mode = #tpu.pipeline_mode<synchronous>, transform_indices = @transform_2, window_bounds = array<i64: 3, 64>}, {pipeline_mode = #tpu.pipeline_mode<synchronous>, transform_indices = @transform_3, window_bounds = array<i64: 2, 64, 64>}, {pipeline_mode = #tpu.pipeline_mode<synchronous>, transform_indices = @transform_4, window_bounds = array<i64: 64, 9>}, {pipeline_mode = #tpu.pipeline_mode<synchronous>, transform_indices = @transform_5, window_bounds = array<i64: 1, 9>}, {transform_indices = @transform_6, window_bounds = array<i64: 8, 9>}]} {
    %c0 = arith.constant 0 : index
    %c0_0 = arith.constant 0 : index
    %0 = vector.load %arg1[%c0, %c0_0] : memref<8x4xf32, #tpu.memory_space<vmem>>, vector<8x4xf32>
    %c0_1 = arith.constant 0 : index
    %c0_2 = arith.constant 0 : index
    %1 = vector.load %arg2[%c0_1, %c0_2] : memref<4x64xf32, #tpu.memory_space<vmem>>, vector<4x64xf32>
    %c0_3 = arith.constant 0 : index
    %c0_4 = arith.constant 0 : index
    %2 = vector.load %arg3[%c0_3, %c0_4] : memref<3x64xf32, #tpu.memory_space<vmem>>, vector<1x64xf32>
    %c1 = arith.constant 1 : index
    %c0_5 = arith.constant 0 : index
    %3 = vector.load %arg3[%c1, %c0_5] : memref<3x64xf32, #tpu.memory_space<vmem>>, vector<1x64xf32>
    %c2 = arith.constant 2 : index
    %c0_6 = arith.constant 0 : index
    %4 = vector.load %arg3[%c2, %c0_6] : memref<3x64xf32, #tpu.memory_space<vmem>>, vector<1x64xf32>
    %5 = vector.extract_strided_slice %0 {offsets = [0, 0], sizes = [8, 1], strides = [1, 1]} : vector<8x4xf32> to vector<8x1xf32>
    %6 = vector.extract_strided_slice %1 {offsets = [0, 0], sizes = [1, 64], strides = [1, 1]} : vector<4x64xf32> to vector<1x64xf32>
    %7 = vector.broadcast %5 : vector<8x1xf32> to vector<8x64xf32>
    %8 = vector.broadcast %6 : vector<1x64xf32> to vector<8x64xf32>
    %9 = arith.mulf %7, %8 : vector<8x64xf32>
    %10 = vector.extract_strided_slice %0 {offsets = [0, 1], sizes = [8, 1], strides = [1, 1]} : vector<8x4xf32> to vector<8x1xf32>
    %11 = vector.extract_strided_slice %1 {offsets = [1, 0], sizes = [1, 64], strides = [1, 1]} : vector<4x64xf32> to vector<1x64xf32>
    %12 = vector.broadcast %10 : vector<8x1xf32> to vector<8x64xf32>
    %13 = vector.broadcast %11 : vector<1x64xf32> to vector<8x64xf32>
    %14 = arith.mulf %12, %13 : vector<8x64xf32>
    %15 = arith.addf %9, %14 : vector<8x64xf32>
    %16 = vector.extract_strided_slice %0 {offsets = [0, 2], sizes = [8, 1], strides = [1, 1]} : vector<8x4xf32> to vector<8x1xf32>
    %17 = vector.extract_strided_slice %1 {offsets = [2, 0], sizes = [1, 64], strides = [1, 1]} : vector<4x64xf32> to vector<1x64xf32>
    %18 = vector.broadcast %16 : vector<8x1xf32> to vector<8x64xf32>
    %19 = vector.broadcast %17 : vector<1x64xf32> to vector<8x64xf32>
    %20 = arith.mulf %18, %19 : vector<8x64xf32>
    %21 = arith.addf %15, %20 : vector<8x64xf32>
    %22 = vector.extract_strided_slice %0 {offsets = [0, 3], sizes = [8, 1], strides = [1, 1]} : vector<8x4xf32> to vector<8x1xf32>
    %23 = vector.extract_strided_slice %1 {offsets = [3, 0], sizes = [1, 64], strides = [1, 1]} : vector<4x64xf32> to vector<1x64xf32>
    %24 = vector.broadcast %22 : vector<8x1xf32> to vector<8x64xf32>
    %25 = vector.broadcast %23 : vector<1x64xf32> to vector<8x64xf32>
    %26 = arith.mulf %24, %25 : vector<8x64xf32>
    %27 = arith.addf %21, %26 : vector<8x64xf32>
    %28 = vector.broadcast %2 : vector<1x64xf32> to vector<8x64xf32>
    %29 = arith.addf %27, %28 : vector<8x64xf32>
    %cst = arith.constant 0.000000e+00 : f32
    %30 = vector.broadcast %cst : f32 to vector<8x64xf32>
    %31 = arith.maximumf %29, %30 : vector<8x64xf32>
    %c0_7 = arith.constant 0 : index
    %c0_8 = arith.constant 0 : index
    %c0_9 = arith.constant 0 : index
    %32 = vector.load %arg4[%c0_7, %c0_8, %c0_9] : memref<2x64x64xf32, #tpu.memory_space<vmem>>, vector<1x64x64xf32>
    %33 = vector.shape_cast %32 : vector<1x64x64xf32> to vector<64x64xf32>
    %cst_10 = arith.constant dense<0.000000e+00> : vector<8x64xf32>
    %34 = tpu.matmul %31, %33, %cst_10 {dimension_numbers = #tpu.dot_dimension_numbers<[1], [0], [0], [1], [0, 0, 1, 1], [], []>} : vector<8x64xf32>, vector<64x64xf32>, vector<8x64xf32> -> vector<8x64xf32>
    %35 = vector.broadcast %3 : vector<1x64xf32> to vector<8x64xf32>
    %36 = arith.addf %34, %35 : vector<8x64xf32>
    %cst_11 = arith.constant 0.000000e+00 : f32
    %37 = vector.broadcast %cst_11 : f32 to vector<8x64xf32>
    %38 = arith.maximumf %36, %37 : vector<8x64xf32>
    %c1_12 = arith.constant 1 : index
    %c0_13 = arith.constant 0 : index
    %c0_14 = arith.constant 0 : index
    %39 = vector.load %arg4[%c1_12, %c0_13, %c0_14] : memref<2x64x64xf32, #tpu.memory_space<vmem>>, vector<1x64x64xf32>
    %40 = vector.shape_cast %39 : vector<1x64x64xf32> to vector<64x64xf32>
    %cst_15 = arith.constant dense<0.000000e+00> : vector<8x64xf32>
    %41 = tpu.matmul %38, %40, %cst_15 {dimension_numbers = #tpu.dot_dimension_numbers<[1], [0], [0], [1], [0, 0, 1, 1], [], []>} : vector<8x64xf32>, vector<64x64xf32>, vector<8x64xf32> -> vector<8x64xf32>
    %42 = vector.broadcast %4 : vector<1x64xf32> to vector<8x64xf32>
    %43 = arith.addf %41, %42 : vector<8x64xf32>
    %cst_16 = arith.constant 0.000000e+00 : f32
    %44 = vector.broadcast %cst_16 : f32 to vector<8x64xf32>
    %45 = arith.maximumf %43, %44 : vector<8x64xf32>
    %c0_17 = arith.constant 0 : index
    %c0_18 = arith.constant 0 : index
    %46 = vector.load %arg5[%c0_17, %c0_18] : memref<64x9xf32, #tpu.memory_space<vmem>>, vector<64x9xf32>
    %cst_19 = arith.constant dense<0.000000e+00> : vector<8x9xf32>
    %47 = tpu.matmul %45, %46, %cst_19 {dimension_numbers = #tpu.dot_dimension_numbers<[1], [0], [0], [1], [0, 0, 1, 1], [], []>} : vector<8x64xf32>, vector<64x9xf32>, vector<8x9xf32> -> vector<8x9xf32>
    %c0_20 = arith.constant 0 : index
    %c0_21 = arith.constant 0 : index
    %48 = vector.load %arg6[%c0_20, %c0_21] : memref<1x9xf32, #tpu.memory_space<vmem>>, vector<1x9xf32>
    %49 = vector.broadcast %48 : vector<1x9xf32> to vector<8x9xf32>
    %50 = arith.addf %47, %49 : vector<8x9xf32>
    %c0_22 = arith.constant 0 : index
    %c0_23 = arith.constant 0 : index
    %51 = vector.load %arg7[%c0_22, %c0_23] : memref<8x9xf32, #tpu.memory_space<vmem>>, vector<8x9xf32>
    tpu.vector_store %arg7[%c0_22, %c0_23], %50 {strides = array<i32>} : memref<8x9xf32, #tpu.memory_space<vmem>>, vector<8x9xf32>,
    return
  }
  func.func @transform_0(%arg0: i32) -> (i32, i32) {
    %c0_i32 = arith.constant 0 : i32
    %c0_i32_0 = arith.constant 0 : i32
    return %arg0, %c0_i32 : i32, i32
  }
  func.func @transform_1(%arg0: i32) -> (i32, i32) {
    %c0_i32 = arith.constant 0 : i32
    %c0_i32_0 = arith.constant 0 : i32
    %c0_i32_1 = arith.constant 0 : i32
    return %c0_i32, %c0_i32_0 : i32, i32
  }
  func.func @transform_2(%arg0: i32) -> (i32, i32) {
    %c0_i32 = arith.constant 0 : i32
    %c0_i32_0 = arith.constant 0 : i32
    %c0_i32_1 = arith.constant 0 : i32
    return %c0_i32, %c0_i32_0 : i32, i32
  }
  func.func @transform_3(%arg0: i32) -> (i32, i32, i32) {
    %c0_i32 = arith.constant 0 : i32
    %c0_i32_0 = arith.constant 0 : i32
    %c0_i32_1 = arith.constant 0 : i32
    %c0_i32_2 = arith.constant 0 : i32
    return %c0_i32, %c0_i32_0, %c0_i32_1 : i32, i32, i32
  }
  func.func @transform_4(%arg0: i32) -> (i32, i32) {
    %c0_i32 = arith.constant 0 : i32
    %c0_i32_0 = arith.constant 0 : i32
    %c0_i32_1 = arith.constant 0 : i32
    return %c0_i32, %c0_i32_0 : i32, i32
  }
  func.func @transform_5(%arg0: i32) -> (i32, i32) {
    %c0_i32 = arith.constant 0 : i32
    %c0_i32_0 = arith.constant 0 : i32
    %c0_i32_1 = arith.constant 0 : i32
    return %c0_i32, %c0_i32_0 : i32, i32
  }
  func.func @transform_6(%arg0: i32) -> (i32, i32) {
    %c0_i32 = arith.constant 0 : i32
    %c0_i32_0 = arith.constant 0 : i32
    return %arg0, %c0_i32 : i32, i32
  }
}

</mosaic_0001>

<bundles_post_ra>
// kernel: tpu_custom_call.1
= control target key start
LH: loop header
LB: loop body
LE: loop exit
PB: predicated region body
PF: predicated region fallthrough
CT: control target
= control target key end

     0   :  { %11 = vsyncpa [#allocation3], 0  ;;  %s689_s0 = inlined_call_operand.vmem [shape: f32[8,4], index: 0, kind: input, shape index: {}]   ;;  %s690_s1 = inlined_call_operand.vmem [shape: f32[4,64], index: 1, kind: input, shape index: {}]   ;;  %s691_s2 = inlined_call_operand.vmem [shape: f32[3,64], index: 2, kind: input, shape index: {}]   ;;  %s692_s3 = inlined_call_operand.hbm [shape: f32[2,64,64], index: 3, kind: input, shape index: {}]   ;;  %s693_s4 = inlined_call_operand.vmem [shape: f32[64,9], index: 4, kind: input, shape index: {}]   ;;  %s694_s5 = inlined_call_operand.vmem [shape: f32[1,9], index: 5, kind: input, shape index: {}]   ;;  %s695_s6 = inlined_call_operand.hbm [shape: f32[8,9], index: 6, kind: output, shape index: {}]  }
   0x1   :  { %12 = vsyncpa [#allocation4], 0  ;;  %s559_s21 = smov [#allocation2]   ;;  %s511_s25 = scalar_lea.hbm %s692_s3, 2048 }
   0x2   :  { %s24_s22 = sshll.u32 %s559_s21, 4  ;;  %p512_p0 = scmp.ne.s32.totalorder %s692_s3, %s511_s25  ;;  %s25_s22 = int_to_ptr.vmem [resolvable:$true] %s24_s22 }
   0x3   :  { %p515_p1 = scmp.lt.u32.totalorder %s511_s25, %s692_s3 }
   0x5   :  { %p517_p2 = pnand %p515_p1, %p512_p0 }
   0x7   :  { %520 = shalt.err (!%p517_p2)
}
   0x8   :  { %s521_s30 = scalar_lea.vmem %s25_s22, 2048  ;;  %p526_p4 = scmp.lt.s32.totalorder %s25_s22, %s25_s22 }
   0x9   :  { %p522_p3 = scmp.ne.s32.totalorder %s25_s22, %s521_s30  ;;  %p527_p5 = scmp.lt.s32.totalorder %s521_s30, %s521_s30 }
   0xb   :  { %p528_p6 = por %p527_p5, %p526_p4 }
   0xd   :  { %p529_p7 = pnand %p528_p6, %p522_p3 }
   0xf   :  { %532 = shalt.err (!%p529_p7)
}
  0x10   :  { %s560_s7 = smov 128   ;;  %s561_s8 = smov 8  }
  0x11   :  { %30 = dma.hbm_to_vmem [thread:$0]  %s692_s3, 2048, %s25_s22, [#allocation3], %s560_s7, %s560_s7, %s561_s8  }
  0x12   :  { %555 = dma.done.wait [#allocation3], 2048  }
  0x13   :  { %556 = vsyncadd [#allocation3], 4294965248  ;;  %v562_v0 = vmov 0   ;;  %v563_v1 = vmov 2   ;;  %v38_v2 = vld [vmem:[%s689_s0] sm:$0xff]  ;;  %v89_v3 = vld [vmem:[#allocation2] sm:$0xff]  ;;  %v48_v28 = vlaneseq }
  0x14   :  { %506 = vset.pattern.permute.xlu0 %v562_v0  ;;  %508 = vset.pattern.permute.xlu1 %v563_v1  ;;  %v90_v4 = vld [vmem:[#allocation2 + $0x8] sm:$0xff]  ;;  %v564_v5 = vmov 0.0|0.0   ;;  %v91_v7 = vld [vmem:[#allocation2 + $0x10] sm:$0xff]  ;;  %v92_v8 = vld [vmem:[#allocation2 + $0x18] sm:$0xff]  ;;  %v565_v9 = vmov 1   ;;  %v566_v10 = vmov 3  }
  0x15   :  { %45 = vperm.xlu0 %506, %v38_v2   ;;  %64 = vperm.xlu1 %508, %v38_v2   ;;  %v460_v6 = vpack.c.bf16 %v90_v4, %v89_v3  ;;  %v463_v11 = vpack.c.bf16 %v92_v8, %v91_v7  ;;  %v93_v12 = vld [vmem:[#allocation2 + $0x20] sm:$0xff]  ;;  %v94_v13 = vld [vmem:[#allocation2 + $0x28] sm:$0xff]  ;;  %v95_v15 = vld [vmem:[#allocation2 + $0x30] sm:$0xff]  ;;  %vm567_vm0 = vmmov 0   ;;  %v568_v18 = vmov 0.0   ;;  %s569_s12 = smov [#allocation5]  }
  0x16   :  { %459 = vmatprep.subr.bf16.mxu0 %v564_v5  ;;  %471 = vmatprep.subr.bf16.mxu1 %v564_v5  ;;  %v466_v14 = vpack.c.bf16 %v94_v13, %v93_v12  ;;  %v96_v16 = vld [vmem:[#allocation2 + $0x38] sm:$0xff]  ;;  %v177_v19 = vld [vmem:[#allocation2 + $0x40] sm:$0xff]  ;;  %v178_v20 = vld [vmem:[#allocation2 + $0x48] sm:$0xff]  ;;  %v49_v29 = vshrl.u32 %v48_v28, 7  ;;  %vm101_vm1 = vcmask 523264   ;;  %s359_s0 = sshll.u32 %s569_s12, 4  ;;  %s360_s0 = int_to_ptr.vmem [resolvable:$true] %s359_s0 }
  0x17   :  { %461 = vmatpush3.bf16.msra.mxu0 %v460_v6  ;;  %v469_v17 = vpack.c.bf16 %v96_v16, %v95_v15  ;;  %418 = vmatprep.mubr.msk.f32.mxu0 %vm567_vm0, %v568_v18  ;;  %v179_v21 = vld [vmem:[#allocation2 + $0x50] sm:$0xff]  ;;  %v472_v22 = vpack.c.bf16 %v178_v20, %v177_v19  ;;  %v180_v23 = vld [vmem:[#allocation2 + $0x58] sm:$0xff]  ;;  %v181_v25 = vld [vmem:[#allocation2 + $0x60] sm:$0xff]  ;;  %vm351_vm2 = vcmask 72704   ;;  %p538_p9 = scmp.lt.s32.totalorder %s360_s0, %s360_s0 }
  0x18   :  { %462 = vmatprep.subr.bf16.mxu0 %v564_v5  ;;  %437 = vmatprep.mubr.msk.f32.mxu1 %vm567_vm0, %v568_v18  ;;  %v475_v24 = vpack.c.bf16 %v180_v23, %v179_v21  ;;  %v182_v26 = vld [vmem:[#allocation2 + $0x68] sm:$0xff]  ;;  %v50_v30 = vsub.s32 0, %v49_v29  ;;  %v59_v31 = vsub.s32 1, %v49_v29  ;;  %v69_v34 = vsub.s32 2, %v49_v29  ;;  %v183_v53 = vld [vmem:[#allocation2 + $0x70] sm:$0xff]  ;;  %v184_v54 = vld [vmem:[#allocation2 + $0x78] sm:$0xff] }
  0x19   :  { %507 = vset.pattern.permute.xlu0 %v565_v9  ;;  %509 = vset.pattern.permute.xlu1 %v566_v10  ;;  %v478_v27 = vpack.c.bf16 %v182_v26, %v181_v25  ;;  %v39_v32 = vld [vmem:[%s690_s1] sm:$0xf]  ;;  %v79_v36 = vsub.s32 3, %v49_v29  ;;  %v481_v55 = vpack.c.bf16 %v184_v54, %v183_v53  ;;  %v264_v57 = vld [vmem:[%s693_s4 + $0x8] sm:$0xff]  ;;  %v265_v58 = vld [vmem:[%s693_s4 + $0x10] sm:$0xff] }
  0x1a   :  { %54 = vperm.xlu0 %507, %v38_v2   ;;  %74 = vperm.xlu1 %509, %v38_v2   ;;  %v51_v37 = vrot.slane %v39_v32, %v50_v30  ;;  %v60_v38 = vrot.slane %v39_v32, %v59_v31  ;;  %v70_v39 = vrot.slane %v39_v32, %v69_v34  ;;  %v368_v49 = vld [vmem:[%s691_s2] ss:$0 sm:$0xff]  ;;  %v266_v60 = vld [vmem:[%s693_s4 + $0x18] sm:$0xff]  ;;  %v268_v63 = vld [vmem:[%s693_s4 + $0x28] sm:$0xff] }
  0x1b   :  { %464 = vmatpush3.bf16.msra.mxu0 %v463_v11  ;;  %473 = vmatpush3.bf16.msra.mxu1 %v472_v22  ;;  %v80_v40 = vrot.slane %v39_v32, %v79_v36  ;;  %v263_v56 = vld [vmem:[%s693_s4] sm:$0xff]  ;;  %v487_v61 = vpack.c.bf16 %v266_v60, %v265_v58  ;;  %v269_v7 = vld [vmem:[%s693_s4 + $0x30] sm:$0xff]  ;;  %v270_v8 = vld [vmem:[%s693_s4 + $0x38] sm:$0xff] }
  0x1c   :  { %465 = vmatprep.subr.bf16.mxu0 %v564_v5  ;;  %474 = vmatprep.subr.bf16.mxu1 %v564_v5  ;;  %v484_v59 = vpack.c.bf16 %v264_v57, %v263_v56  ;;  %v267_v62 = vld [vmem:[%s693_s4 + $0x20] sm:$0xff]  ;;  %v493_v9 = vpack.c.bf16 %v270_v8, %v269_v7  ;;  %s533_s4 = scalar_lea.vmem %s360_s0, 128 }
  0x1d   :  { %v490_v0 = vpack.c.bf16 %v268_v63, %v267_v62  ;;  %v369_v1 = vld [vmem:[%s691_s2 + $0x1] ss:$0 sm:$0xff]  ;;  %p534_p8 = scmp.ne.s32.totalorder %s360_s0, %s533_s4  ;;  %p539_p10 = scmp.lt.s32.totalorder %s533_s4, %s533_s4 }
  0x1e   :  { %510 = vset.pattern.permute.xlu0 %v566_v10 }
  0x1f   :  { %467 = vmatpush3.bf16.msra.mxu0 %v466_v14  ;;  %476 = vmatpush3.bf16.msra.mxu1 %v475_v24  ;;  %v373_v14 = vld [vmem:[%s694_s5] ss:$0 sm:$0xff]  ;;  %p540_p11 = por %p539_p10, %p538_p9 }
  0x20   :  { %468 = vmatprep.subr.bf16.mxu0 %v564_v5  ;;  %477 = vmatprep.subr.bf16.mxu1 %v564_v5 }
  0x21   :  { %p541_p12 = pnand %p540_p11, %p534_p8 }
  0x23   :  { %470 = vmatpush3.bf16.msra.mxu0 %v469_v17  ;;  %479 = vmatpush3.bf16.msra.mxu1 %v478_v27 }
  0x24   :  { %483 = vmatprep.subr.bf16.mxu0 %v564_v5  ;;  %480 = vmatprep.subr.bf16.mxu1 %v564_v5 }
  0x27   :  { %482 = vmatpush3.bf16.msra.mxu1 %v481_v55 }
  0x94   :  { %v46_v33 = vpop.permute.xlu0 %45  ;;  %v65_v35 = vpop.permute.xlu1 %64 }
  0x95   :  { %v52_v43 = vmul.f32 %v51_v37, %v46_v33  ;;  %v71_v45 = vmul.f32 %v70_v39, %v65_v35 }
  0x99   :  { %v55_v41 = vpop.permute.xlu0 %54  ;;  %v75_v42 = vpop.permute.xlu1 %74 }
  0x9a   :  { %v61_v44 = vmul.f32 %v60_v38, %v55_v41  ;;  %v81_v47 = vmul.f32 %v80_v40, %v75_v42 }
  0x9c   :  { %v62_v46 = vadd.f32 %v61_v44, %v52_v43 }
  0x9e   :  { %v72_v48 = vadd.f32 %v71_v45, %v62_v46 }
  0xa0   :  { %v82_v50 = vadd.f32 %v81_v47, %v72_v48 }
  0xa2   :  { %v87_v51 = vadd.f32 %v368_v49, %v82_v50 }
  0xa4   :  { %v88_v52 = vmax.f32 %v87_v51, 0.0 }
  0xa6   :  { %419 = vmatmul.mubr.msk.f32.vlgmr.msra.gmra.mrb[0].mxu0 %vm101_vm1, %v88_v52 }
  0xa7   :  { %456 = vmatprep.mubr.msk.f32.mxu0 %vm567_vm0, %v568_v18  ;;  %485 = vmatpush3.bf16.msra.mxu0 %v484_v59 }
  0xa8   :  { %486 = vmatprep.subr.bf16.mxu0 %v564_v5 }
  0xab   :  { %488 = vmatpush3.bf16.msra.mxu0 %v487_v61 }
  0xac   :  { %489 = vmatprep.subr.bf16.mxu0 %v564_v5 }
  0xaf   :  { %491 = vmatpush3.bf16.msra.mxu0 %v490_v0 }
  0xb0   :  { %492 = vmatprep.subr.bf16.mxu0 %v564_v5  ;;  %v371_v5 = vld [vmem:[%s691_s2 + $0x2] ss:$0 sm:$0xff] }
  0xb3   :  { %494 = vmatpush3.bf16.msra.mxu0 %v493_v9 }
 0x179   :  { %v171_v2 = vpop.f32.mrb[0].mxu0 }
 0x17a   :  { %v172_v3 = vadd.f32 %v369_v1, %v171_v2  ;;  %v420_v4 = vpop.f32.mrb[1].mxu0 }
 0x17c   :  { %v175_v6 = vmax.f32 %v172_v3, 0.0 }
 0x17e   :  { %438 = vmatmul.mubr.msk.f32.vlgmr.msra.gmra.mrb[0].mxu1 %vm101_vm1, %v175_v6 }
 0x251   :  { %v258_v10 = vpop.f32.mrb[0].mxu1 }
 0x252   :  { %v259_v11 = vadd.f32 %v371_v5, %v258_v10  ;;  %v439_v12 = vpop.f32.mrb[1].mxu1 }
 0x254   :  { %v262_v13 = vmax.f32 %v259_v11, 0.0 }
 0x256   :  { %457 = vmatmul.mubr.msk.f32.vlgmr.msra.gmra.mrb[2].mxu0 %vm101_vm1, %v262_v13 }
 0x329   :  { %v347_v15 = vpop.f32.mrb[2].mxu0 }
 0x32a   :  { %v348_v16 = vadd.f32 %v373_v14, %v347_v15  ;;  %v458_v17 = vpop.f32.mrb[3].mxu0 }
 0x32c   :  { %352 = vst.msk [vmem:[#allocation5] sm:$0xff] %vm351_vm2, %v348_v16 }
 0x32d   :  { %544 = shalt.err (!%p541_p12)
}
 0x32e   :  { %s545_s13 = scalar_lea.hbm %s695_s6, 128 }
 0x32f   :  { %p546_p13 = scmp.ne.s32.totalorder %s695_s6, %s545_s13  ;;  %p549_p0 = scmp.lt.u32.totalorder %s545_s13, %s695_s6 }
 0x331   :  { %p551_p1 = pnand %p549_p0, %p546_p13 }
 0x333   :  { %554 = shalt.err (!%p551_p1)
}
 0x334   :  { %362 = dma.vmem_to_hbm [thread:$0]  %s360_s0, 128, %s695_s6, [#allocation4]  }
 0x335   :  { %557 = dma.done.wait [#allocation4], 128  }
 0x336   :  { %558 = vsyncadd [#allocation4], 4294967168 }
 0x337   :  { %366 = vsyncpa [#allocation3], 1 }
 0x338   :  { %367 = vsyncpa [#allocation4], 1 }

</bundles_post_ra>
